<compile_context>
chip_gen: v7x
topology: tpu7x:2x2x1
jax: 0.10.0
libtpu: 0.0.40
codegen_flags: <defaults>
</compile_context>

<pallas_src>
import jax
import jax.numpy as jnp
from jax.experimental import pallas as pl
from jax.experimental.pallas import tpu as pltpu


def _identity_dma_kernel(x_hbm_ref, o_hbm_ref):
    """Single HBM->HBM DMA copy; no VMEM staging, no grid."""
    def body(sem):
        cp = pltpu.make_async_copy(x_hbm_ref, o_hbm_ref, sem)
        cp.start()
        cp.wait()

    pl.run_scoped(body, pltpu.SemaphoreType.DMA(()))


def identity_pallas(x):
    """Copy x through a Pallas kernel (identity). Returns array identical to x."""
    if x.size == 0:
        return x

    nbytes = x.size * jnp.dtype(x.dtype).itemsize
    return pl.pallas_call(
        _identity_dma_kernel,
        out_shape=jax.ShapeDtypeStruct(x.shape, x.dtype),
        in_specs=[pl.BlockSpec(memory_space=pl.ANY)],
        out_specs=pl.BlockSpec(memory_space=pl.ANY),
        cost_estimate=pl.CostEstimate(
            flops=0, transcendentals=0, bytes_accessed=2 * nbytes
        ),
    )(x)


def identity_function_forward(x, T):
    """JAX/Pallas equivalent of IdentityFunction.forward(x, T) -> (x, None, None)."""
    # T is accepted but unused, exactly as in the PyTorch module.
    # Zero-copy alternative (true optimum): `return (x, None, None)`.
    return (identity_pallas(x), None, None)


if __name__ == "__main__":
    key = jax.random.PRNGKey(0)
    # Small NCHW feature map: batch=2, channels=4, spatial=16x16.
    x = jax.random.normal(key, (2, 4, 16, 16), dtype=jnp.float32)
    T = 5  # unused, mirrors the PyTorch signature

    out, none1, none2 = identity_function_forward(x, T)
    out = jax.block_until_ready(out)

    assert none1 is None and none2 is None
    assert out.shape == x.shape and out.dtype == x.dtype
    assert bool(jnp.all(out == x))

    # Lane-ragged / odd-sized shape: previously needed a pad + slice round trip;
    # the flat HBM->HBM DMA handles it directly with no extra traffic.
    k2 = jax.random.PRNGKey(0)
    y = jax.random.normal(k2, (3, 5, 7), dtype=jnp.bfloat16)
    out_y, _, _ = identity_function_forward(y, T)
    out_y = jax.block_until_ready(out_y)
    assert out_y.shape == y.shape and out_y.dtype == y.dtype
    assert bool(jnp.all(out_y == y))

    print("KERNEL_OK")
</pallas_src>

<mosaic_0001>
module attributes {stable_mosaic.version = 11 : i64} {
  func.func @_identity_dma_kernel(%arg0: memref<2x4x16x16xf32, #tpu.memory_space<any>>, %arg1: memref<2x4x16x16xf32, #tpu.memory_space<any>>) attributes {dimension_semantics = [], scalar_prefetch = 0 : i64, scratch_operands = 0 : i64, tpu.core_type = #tpu.core_type<tc>} {
    "tpu.region"() ({
      %0 = tpu.sem_alloc : memref<!tpu.dma_semaphore, #tpu.memory_space<semaphore_mem>>
      tpu.enqueue_dma source(%arg0 : memref<2x4x16x16xf32, #tpu.memory_space<any>>) target(%arg1 : memref<2x4x16x16xf32, #tpu.memory_space<any>>) target_semaphore(%0 : memref<!tpu.dma_semaphore, #tpu.memory_space<semaphore_mem>>)
      tpu.wait_dma2 semaphore(%0 : memref<!tpu.dma_semaphore, #tpu.memory_space<semaphore_mem>>) src(%arg0 : memref<2x4x16x16xf32, #tpu.memory_space<any>>) dst(%arg1 : memref<2x4x16x16xf32, #tpu.memory_space<any>>)
      tpu.yield
    }) : () -> ()
    return
  }
}

</mosaic_0001>

<bundles_post_ra>
// kernel: tpu_custom_call.1
= control target key start
LH: loop header
LB: loop body
LE: loop exit
PB: predicated region body
PF: predicated region fallthrough
CT: control target
= control target key end

     0   :  { %s29_s6 = smov [#allocation2]   ;;  %s30_s7 = smov [#allocation3]   ;;  %s48_s0 = inlined_call_operand.hbm [shape: f32[2,4,16,16], index: 0, kind: input, shape index: {}]   ;;  %s49_s1 = inlined_call_operand.hbm [shape: f32[2,4,16,16], index: 1, kind: output, shape index: {}]  }
   0x1   :  { %s31_s8 = smov 0  }
   0x2   :  { %18 = dma.general %s48_s0, 2048, %s49_s1, %s29_s6, %s30_s7, [#allocation4], %s31_s8, 0  }
   0x3   :  { %27 = dma.done.wait [#allocation2], 2048 }
   0x4   :  { %28 = vsyncadd [#allocation2], 4294965248 }

</bundles_post_ra>
